<compile_context>
chip_gen: v7x
topology: tpu7x:2x2x1
jax: 0.10.0
libtpu: 0.0.40
codegen_flags: <defaults>
</compile_context>

<pallas_src>
import functools

import jax
import jax.numpy as jnp
from jax import lax
from jax.experimental import pallas as pl
from jax.experimental.pallas import tpu as pltpu


def _dice_partial_kernel(p_ref, t_ref, pt_ref, sq_ref, *,
                         last_c, last_k, valid_lanes, ragged):
    """Accumulate per-row partial sums for the Dice loss.

    p_ref/t_ref: (Rb, tile) tile of predict / target (native dtype).
    pt_ref:      (Rb, 1) running sum of predict*target       for this (split, row-block).
    sq_ref:      (Rb, 1) running sum of predict^2 + target^2 for this (split, row-block).
    """
    c = pl.program_id(0)          # reduction split (2-way only on v7x)
    k = pl.program_id(2)          # lane chunk within the split (reduction axis)

    @pl.when(k == 0)
    def _init():
        pt_ref[...] = jnp.zeros_like(pt_ref)
        sq_ref[...] = jnp.zeros_like(sq_ref)

    def _accumulate(p, t):
        pt_ref[...] += jnp.sum(p * t, axis=-1, keepdims=True)
        sq_ref[...] += jnp.sum(p * p + t * t, axis=-1, keepdims=True)

    if not ragged:
        # All chunks are full: no mask work anywhere in the hot loop.
        _accumulate(p_ref[...].astype(jnp.float32),
                    t_ref[...].astype(jnp.float32))
    else:
        is_last = jnp.logical_and(c == last_c, k == last_k)

        @pl.when(jnp.logical_not(is_last))
        def _fast():
            _accumulate(p_ref[...].astype(jnp.float32),
                        t_ref[...].astype(jnp.float32))

        @pl.when(is_last)
        def _masked():
            # Only the single ragged chunk pays for the iota/compare/selects,
            # and the compare is against a compile-time constant.
            lane = lax.broadcasted_iota(jnp.int32, p_ref.shape, 1)
            mask = lane < valid_lanes
            p = jnp.where(mask, p_ref[...].astype(jnp.float32), 0.0)
            t = jnp.where(mask, t_ref[...].astype(jnp.float32), 0.0)
            _accumulate(p, t)


def _chip_config():
    """Returns (tensorcores_per_chip, vmem_limit_bytes, tile_budget_bytes)."""
    try:
        kind = jax.devices()[0].device_kind.lower()
    except Exception:
        kind = ""
    is_v7x = ("v7" in kind) or ("7x" in kind)
    if is_v7x:
        # 64 MiB physical VMEM per TensorCore -> keep the tighter budget.
        return 2, 32 * 1024 * 1024, 24 * 1024 * 1024
    # v5e / v6e: 128 MiB physical VMEM, single TensorCore.
    return 1, 64 * 1024 * 1024, 48 * 1024 * 1024


def dice_loss(predict, target, *, smooth=1.0, max_tile=16384):
    """predict, target: (N, C, *spatial) arrays of identical shape -> scalar f32."""
    assert predict.shape == target.shape, "predict & target shape do not match"
    N, C = predict.shape[0], predict.shape[1]
    hw = 1
    for d in predict.shape[2:]:
        hw *= d
    R = N * C
    dbytes = jnp.dtype(predict.dtype).itemsize

    n_tc, vmem_limit, budget = _chip_config()

    # ---- skinny-R row folding (free contiguous reshape) --------------------
    pack = 8 if dbytes >= 4 else (16 if dbytes == 2 else 32)
    g = 1
    if R < 64 or R % pack != 0:
        while hw % (2 * g) == 0 and hw // (2 * g) >= 128 and R * g < 512:
            g *= 2
    R_eff = R * g
    hw_eff = hw // g

    p = predict.reshape(R_eff, hw_eff)   # native dtype, no pad / cast pass
    t = target.reshape(R_eff, hw_eff)

    # ---- tile selection -----------------------------------------------------
    # 2 inputs x 2 pipeline buffers in native dtype + ~2 f32 temp columns/row.
    per_col = 4 * dbytes + 2 * 4
    lanes_cap = budget // (R_eff * per_col)
    if lanes_cap >= 128:
        Rb = R_eff                                    # whole rows resident
    else:
        # Very large N*C: block the row dim too so the lane tile stays >= 512.
        Rb = (budget // (per_col * 512)) // 8 * 8
        Rb = max(8, min(Rb, R_eff))
    tile = budget // (Rb * per_col)
    tile = min((tile // 128) * 128, max_tile, pl.cdiv(hw_eff, 128) * 128)
    tile = max(128, tile)

    k_total = pl.cdiv(hw_eff, tile)

    # ---- reduction split: only on 2-TensorCore chips (v7x) ------------------
    n_splits, k_half = 1, k_total
    if n_tc == 2 and k_total >= 2:
        if k_total % 2 != 0:
            # Shrink the tile until the chunk count is even, so neither core
            # ever gets a dead (fully out-of-range) chunk.
            t_try = tile
            while t_try > 128 and pl.cdiv(hw_eff, t_try) % 2 != 0:
                t_try -= 128
            if pl.cdiv(hw_eff, t_try) % 2 == 0:
                tile = t_try
                k_total = pl.cdiv(hw_eff, tile)
        if k_total % 2 == 0:
            n_splits, k_half = 2, k_total // 2

    n_rblocks = pl.cdiv(R_eff, Rb)

    ragged = (hw_eff % tile) != 0
    last_c = (k_total - 1) // k_half
    last_k = (k_total - 1) % k_half
    valid_lanes = hw_eff - (k_total - 1) * tile        # static Python int

    kernel = functools.partial(
        _dice_partial_kernel,
        last_c=last_c, last_k=last_k, valid_lanes=valid_lanes, ragged=ragged)

    in_map = lambda c, r, k: (r, c * k_half + k)       # never out of range
    out_map = lambda c, r, k: (c, r, 0)                # resident across k

    out_pt, out_sq = pl.pallas_call(
        kernel,
        out_shape=(
            jax.ShapeDtypeStruct((n_splits, R_eff, 1), jnp.float32),
            jax.ShapeDtypeStruct((n_splits, R_eff, 1), jnp.float32),
        ),
        grid_spec=pltpu.PrefetchScalarGridSpec(
            num_scalar_prefetch=0,
            grid=(n_splits, n_rblocks, k_half),
            in_specs=[
                pl.BlockSpec((Rb, tile), in_map),
                pl.BlockSpec((Rb, tile), in_map),
            ],
            out_specs=(
                pl.BlockSpec((None, Rb, 1), out_map),
                pl.BlockSpec((None, Rb, 1), out_map),
            ),
        ),
        compiler_params=pltpu.CompilerParams(
            # TODO(synk): on v7x confirm "parallel" on the leading axis really
            # shards the two halves across TensorCores (else use CORE_PARALLEL).
            dimension_semantics=("parallel", "parallel", "arbitrary"),
            vmem_limit_bytes=vmem_limit,
        ),
        cost_estimate=pl.CostEstimate(
            flops=5 * R * hw,
            transcendentals=0,
            bytes_accessed=2 * R * hw * dbytes + 2 * 4 * n_splits * R_eff,
        ),
    )(p, t)

    # Tiny final combine in plain JAX: BinaryDiceLoss 'mean' over batch,
    # then sum over classes / C (DiceLoss).
    spt = jnp.sum(out_pt[:, :, 0], axis=0)             # (R_eff,)
    ssq = jnp.sum(out_sq[:, :, 0], axis=0)
    if g > 1:
        spt = jnp.sum(spt.reshape(R, g), axis=1)
        ssq = jnp.sum(ssq.reshape(R, g), axis=1)
    spt = spt.reshape(N, C)
    ssq = ssq.reshape(N, C)
    loss = 1.0 - (spt + smooth) / (ssq + smooth)        # (N, C)
    return jnp.sum(jnp.mean(loss, axis=0)) / C


def _dice_loss_ref(predict, target, smooth=1.0):
    """Pure-JAX reference mirroring the PyTorch module."""
    N, C = predict.shape[0], predict.shape[1]
    p = predict.reshape(N, C, -1).astype(jnp.float32)
    t = target.reshape(N, C, -1).astype(jnp.float32)
    num = jnp.sum(p * t, axis=-1) + smooth
    den = jnp.sum(p * p + t * t, axis=-1) + smooth
    loss = 1.0 - num / den                     # (N, C)
    per_class = jnp.mean(loss, axis=0)         # BinaryDiceLoss 'mean'
    return jnp.sum(per_class) / C


if __name__ == "__main__":
    key = jax.random.PRNGKey(0)
    k1, k2 = jax.random.split(key)

    N, C, H, W = 2, 4, 16, 16
    predict = jax.nn.sigmoid(jax.random.normal(k1, (N, C, H, W), jnp.float32))
    target = (jax.random.uniform(k2, (N, C, H, W), jnp.float32) > 0.5).astype(
        jnp.float32
    )

    out = dice_loss(predict, target)
    out = jax.block_until_ready(out)

    ref = _dice_loss_ref(predict, target)
    assert jnp.allclose(out, ref, rtol=1e-5, atol=1e-6), (out, ref)

    print("KERNEL_OK")
</pallas_src>

<mosaic_0001>
module attributes {stable_mosaic.version = 11 : i64} {
  func.func @_dice_partial_kernel(%arg0: i32, %arg1: i32, %arg2: i32, %arg3: memref<16x128xf32, #tpu.memory_space<vmem>>, %arg4: memref<16x128xf32, #tpu.memory_space<vmem>>, %arg5: memref<1x16x1xf32, #tpu.memory_space<vmem>>, %arg6: memref<1x16x1xf32, #tpu.memory_space<vmem>>) attributes {dimension_semantics = [#tpu.dimension_semantics<parallel>, #tpu.dimension_semantics<parallel>, #tpu.dimension_semantics<arbitrary>], iteration_bounds = array<i64: 1, 1, 1>, scalar_prefetch = 0 : i64, scratch_operands = 0 : i64, tpu.core_type = #tpu.core_type<tc>, window_params = [{transform_indices = @transform_0, window_bounds = array<i64: 16, 128>}, {transform_indices = @transform_1, window_bounds = array<i64: 16, 128>}, {transform_indices = @transform_2, window_bounds = array<i64: 1, 16, 1>}, {transform_indices = @transform_3, window_bounds = array<i64: 1, 16, 1>}]} {
    %c0_i32 = arith.constant 0 : i32
    %0 = arith.cmpi eq, %arg2, %c0_i32 : i32
    %1 = arith.extui %0 : i1 to i32
    %c0_i32_0 = arith.constant 0 : i32
    %2 = arith.cmpi ne, %1, %c0_i32_0 : i32
    scf.if %2 {
      %cst_17 = arith.constant 0.000000e+00 : f32
      %25 = vector.broadcast %cst_17 : f32 to vector<16x1xf32>
      %c0_18 = arith.constant 0 : index
      %c0_19 = arith.constant 0 : index
      %c0_20 = arith.constant 0 : index
      %26 = vector.load %arg5[%c0_18, %c0_19, %c0_20] : memref<1x16x1xf32, #tpu.memory_space<vmem>>, vector<1x16x1xf32>
      %27 = vector.shape_cast %26 : vector<1x16x1xf32> to vector<16x1xf32>
      %28 = vector.shape_cast %25 : vector<16x1xf32> to vector<1x16x1xf32>
      tpu.vector_store %arg5[%c0_18, %c0_19, %c0_20], %28 {strides = array<i32>} : memref<1x16x1xf32, #tpu.memory_space<vmem>>, vector<1x16x1xf32>,
      %cst_21 = arith.constant 0.000000e+00 : f32
      %29 = vector.broadcast %cst_21 : f32 to vector<16x1xf32>
      %c0_22 = arith.constant 0 : index
      %c0_23 = arith.constant 0 : index
      %c0_24 = arith.constant 0 : index
      %30 = vector.load %arg6[%c0_22, %c0_23, %c0_24] : memref<1x16x1xf32, #tpu.memory_space<vmem>>, vector<1x16x1xf32>
      %31 = vector.shape_cast %30 : vector<1x16x1xf32> to vector<16x1xf32>
      %32 = vector.shape_cast %29 : vector<16x1xf32> to vector<1x16x1xf32>
      tpu.vector_store %arg6[%c0_22, %c0_23, %c0_24], %32 {strides = array<i32>} : memref<1x16x1xf32, #tpu.memory_space<vmem>>, vector<1x16x1xf32>,
    } else {
    }
    %c0 = arith.constant 0 : index
    %c0_1 = arith.constant 0 : index
    %3 = vector.load %arg3[%c0, %c0_1] : memref<16x128xf32, #tpu.memory_space<vmem>>, vector<16x128xf32>
    %c0_2 = arith.constant 0 : index
    %c0_3 = arith.constant 0 : index
    %4 = vector.load %arg4[%c0_2, %c0_3] : memref<16x128xf32, #tpu.memory_space<vmem>>, vector<16x128xf32>
    %c0_4 = arith.constant 0 : index
    %c0_5 = arith.constant 0 : index
    %c0_6 = arith.constant 0 : index
    %5 = vector.load %arg5[%c0_4, %c0_5, %c0_6] : memref<1x16x1xf32, #tpu.memory_space<vmem>>, vector<1x16x1xf32>
    %6 = vector.shape_cast %5 : vector<1x16x1xf32> to vector<16x1xf32>
    %7 = arith.mulf %3, %4 : vector<16x128xf32>
    %cst = arith.constant dense<0.000000e+00> : vector<16xf32>
    %8 = vector.multi_reduction <add>, %7, %cst [1] : vector<16x128xf32> to vector<16xf32>
    %9 = vector.shape_cast %8 : vector<16xf32> to vector<16x1xf32>
    %10 = arith.addf %6, %9 : vector<16x1xf32>
    %c0_7 = arith.constant 0 : index
    %c0_8 = arith.constant 0 : index
    %c0_9 = arith.constant 0 : index
    %11 = vector.load %arg5[%c0_7, %c0_8, %c0_9] : memref<1x16x1xf32, #tpu.memory_space<vmem>>, vector<1x16x1xf32>
    %12 = vector.shape_cast %11 : vector<1x16x1xf32> to vector<16x1xf32>
    %13 = vector.shape_cast %10 : vector<16x1xf32> to vector<1x16x1xf32>
    tpu.vector_store %arg5[%c0_7, %c0_8, %c0_9], %13 {strides = array<i32>} : memref<1x16x1xf32, #tpu.memory_space<vmem>>, vector<1x16x1xf32>,
    %c0_10 = arith.constant 0 : index
    %c0_11 = arith.constant 0 : index
    %c0_12 = arith.constant 0 : index
    %14 = vector.load %arg6[%c0_10, %c0_11, %c0_12] : memref<1x16x1xf32, #tpu.memory_space<vmem>>, vector<1x16x1xf32>
    %15 = vector.shape_cast %14 : vector<1x16x1xf32> to vector<16x1xf32>
    %16 = arith.mulf %3, %3 : vector<16x128xf32>
    %17 = arith.mulf %4, %4 : vector<16x128xf32>
    %18 = arith.addf %16, %17 : vector<16x128xf32>
    %cst_13 = arith.constant dense<0.000000e+00> : vector<16xf32>
    %19 = vector.multi_reduction <add>, %18, %cst_13 [1] : vector<16x128xf32> to vector<16xf32>
    %20 = vector.shape_cast %19 : vector<16xf32> to vector<16x1xf32>
    %21 = arith.addf %15, %20 : vector<16x1xf32>
    %c0_14 = arith.constant 0 : index
    %c0_15 = arith.constant 0 : index
    %c0_16 = arith.constant 0 : index
    %22 = vector.load %arg6[%c0_14, %c0_15, %c0_16] : memref<1x16x1xf32, #tpu.memory_space<vmem>>, vector<1x16x1xf32>
    %23 = vector.shape_cast %22 : vector<1x16x1xf32> to vector<16x1xf32>
    %24 = vector.shape_cast %21 : vector<16x1xf32> to vector<1x16x1xf32>
    tpu.vector_store %arg6[%c0_14, %c0_15, %c0_16], %24 {strides = array<i32>} : memref<1x16x1xf32, #tpu.memory_space<vmem>>, vector<1x16x1xf32>,
    return
  }
  func.func @transform_0(%arg0: i32, %arg1: i32, %arg2: i32) -> (i32, i32) {
    %c1_i32 = arith.constant 1 : i32
    %0 = arith.muli %arg0, %c1_i32 : i32
    %1 = arith.addi %0, %arg2 : i32
    %c0_i32 = arith.constant 0 : i32
    return %arg1, %1 : i32, i32
  }
  func.func @transform_1(%arg0: i32, %arg1: i32, %arg2: i32) -> (i32, i32) {
    %c1_i32 = arith.constant 1 : i32
    %0 = arith.muli %arg0, %c1_i32 : i32
    %1 = arith.addi %0, %arg2 : i32
    %c0_i32 = arith.constant 0 : i32
    return %arg1, %1 : i32, i32
  }
  func.func @transform_2(%arg0: i32, %arg1: i32, %arg2: i32) -> (i32, i32, i32) {
    %c0_i32 = arith.constant 0 : i32
    %c0_i32_0 = arith.constant 0 : i32
    return %arg0, %arg1, %c0_i32 : i32, i32, i32
  }
  func.func @transform_3(%arg0: i32, %arg1: i32, %arg2: i32) -> (i32, i32, i32) {
    %c0_i32 = arith.constant 0 : i32
    %c0_i32_0 = arith.constant 0 : i32
    return %arg0, %arg1, %c0_i32 : i32, i32, i32
  }
}

</mosaic_0001>

<bundles_post_ra>
// kernel: tpu_custom_call.1
= control target key start
LH: loop header
LB: loop body
LE: loop exit
PB: predicated region body
PF: predicated region fallthrough
CT: control target
= control target key end

     0   :  { %9 = vsyncpa [#allocation3], 0  ;;  %s332_s0 = inlined_call_operand.hbm [shape: f32[16,128], index: 0, kind: input, shape index: {}]   ;;  %s333_s1 = inlined_call_operand.hbm [shape: f32[16,128], index: 1, kind: input, shape index: {}]   ;;  %s334_s2 = inlined_call_operand.hbm [shape: f32[1,16,1], index: 2, kind: output, shape index: {0}]   ;;  %s335_s3 = inlined_call_operand.hbm [shape: f32[1,16,1], index: 3, kind: output, shape index: {1}]  }
   0x1   :  { %10 = vsyncpa [#allocation6], 0 }
   0x2   :  { %11 = vsyncpa [#allocation4], 0 }
   0x3   :  { %12 = vsyncpa [#allocation9], 0  ;;  %s230_s12 = smov [#allocation2]   ;;  %s134_s16 = scalar_lea.hbm %s332_s0, 256 }
   0x4   :  { %s21_s13 = sshll.u32 %s230_s12, 4  ;;  %p135_p0 = scmp.ne.s32.totalorder %s332_s0, %s134_s16  ;;  %s22_s13 = int_to_ptr.vmem [resolvable:$true] %s21_s13 }
   0x5   :  { %p138_p1 = scmp.lt.u32.totalorder %s134_s16, %s332_s0 }
   0x7   :  { %p140_p2 = pnand %p138_p1, %p135_p0 }
   0x9   :  { %143 = shalt.err (!%p140_p2)
}
   0xa   :  { %s144_s21 = scalar_lea.vmem %s22_s13, 256  ;;  %p149_p4 = scmp.lt.s32.totalorder %s22_s13, %s22_s13 }
   0xb   :  { %p145_p3 = scmp.ne.s32.totalorder %s22_s13, %s144_s21  ;;  %p150_p5 = scmp.lt.s32.totalorder %s144_s21, %s144_s21 }
   0xd   :  { %p151_p6 = por %p150_p5, %p149_p4 }
   0xf   :  { %p152_p7 = pnand %p151_p6, %p145_p3 }
  0x11   :  { %155 = shalt.err (!%p152_p7)
}
  0x12   :  { %s231_s22 = smov 128   ;;  %s232_s23 = smov 8  }
  0x13   :  { %27 = dma.hbm_to_vmem [thread:$0]  %s332_s0, 256, %s22_s13, [#allocation3], %s231_s22, %s231_s22, %s232_s23  }
  0x14   :  { %s233_s26 = smov [#allocation5]   ;;  %s156_s30 = scalar_lea.hbm %s333_s1, 256 }
  0x15   :  { %s36_s27 = sshll.u32 %s233_s26, 4  ;;  %p157_p8 = scmp.ne.s32.totalorder %s333_s1, %s156_s30  ;;  %s37_s27 = int_to_ptr.vmem [resolvable:$true] %s36_s27 }
  0x16   :  { %p160_p9 = scmp.lt.u32.totalorder %s156_s30, %s333_s1 }
  0x18   :  { %p162_p10 = pnand %p160_p9, %p157_p8 }
  0x1a   :  { %165 = shalt.err (!%p162_p10)
}
  0x1b   :  { %s166_s8 = scalar_lea.vmem %s37_s27, 256  ;;  %p171_p12 = scmp.lt.s32.totalorder %s37_s27, %s37_s27 }
  0x1c   :  { %p167_p11 = scmp.ne.s32.totalorder %s37_s27, %s166_s8  ;;  %p172_p13 = scmp.lt.s32.totalorder %s166_s8, %s166_s8 }
  0x1e   :  { %p173_p0 = por %p172_p13, %p171_p12 }
  0x20   :  { %p174_p1 = pnand %p173_p0, %p167_p11 }
  0x22   :  { %177 = shalt.err (!%p174_p1)
}
  0x23   :  { %42 = dma.hbm_to_vmem [thread:$0]  %s333_s1, 256, %s37_s27, [#allocation6], %s231_s22, %s231_s22, %s232_s23  }
  0x24   :  { %222 = dma.done.wait [#allocation3], 256  }
  0x25   :  { %223 = vsyncadd [#allocation3], 4294967040 }
  0x26   :  { %224 = dma.done.wait [#allocation6], 256  }
  0x27   :  { %225 = vsyncadd [#allocation6], 4294967040  ;;  %vm55_vm0 = vcmask 7168   ;;  %v234_v0 = vmov 0.0   ;;  %v60_v1 = vld [vmem:[#allocation2] sm:$0xff]  ;;  %v62_v2 = vld [vmem:[#allocation5] sm:$0xff] }
  0x28   :  { %58 = vst.msk [vmem:[#allocation8] sm:$0xff] %vm55_vm0, %v234_v0  ;;  %56 = vst.msk [vmem:[#allocation7] sm:$0xff] %vm55_vm0, %v234_v0  ;;  %v61_v3 = vld [vmem:[#allocation2 + $0x8] sm:$0xff]  ;;  %v79_v4 = vmul.f32 %v60_v1, %v60_v1  ;;  %v81_v5 = vmul.f32 %v62_v2, %v62_v2  ;;  %v66_v6 = vmul.f32 %v62_v2, %v60_v1  ;;  %v63_v7 = vld [vmem:[#allocation5 + $0x8] sm:$0xff]  ;;  %s235_s1 = smov [#allocation7]   ;;  %s236_s11 = smov [#allocation8]  }
  0x29   :  { %57 = vst.msk [vmem:[#allocation7 + $0x8] sm:$0xff] %vm55_vm0, %v234_v0  ;;  %59 = vst.msk [vmem:[#allocation8 + $0x8] sm:$0xff] %vm55_vm0, %v234_v0  ;;  %v80_v8 = vmul.f32 %v61_v3, %v61_v3  ;;  %v82_v9 = vmul.f32 %v63_v7, %v63_v7  ;;  %v67_v11 = vmul.f32 %v63_v7, %v61_v3  ;;  %s98_s10 = sshll.u32 %s235_s1, 4  ;;  %s110_s12 = sshll.u32 %s236_s11, 4  ;;  %s99_s10 = int_to_ptr.vmem [resolvable:$true] %s98_s10  ;;  %s294_s12 = int_to_ptr.vmem [resolvable:$true] %s110_s12 }
  0x2a   :  { %v83_v10 = vadd.f32 %v81_v5, %v79_v4  ;;  %68 = vadd.xlane.f32.xlu0 %v66_v6  ;;  %s178_s13 = scalar_lea.vmem %s99_s10, 256  ;;  %p183_p3 = scmp.lt.s32.totalorder %s99_s10, %s99_s10 }
  0x2b   :  { %v84_v12 = vadd.f32 %v82_v9, %v80_v8  ;;  %p179_p2 = scmp.ne.s32.totalorder %s99_s10, %s178_s13  ;;  %p184_p4 = scmp.lt.s32.totalorder %s178_s13, %s178_s13 }
  0x2c   :  { %85 = vadd.xlane.f32.xlu1 %v83_v10 }
  0x2d   :  { %p185_p5 = por %p184_p4, %p183_p3 }
  0x2e   :  { %70 = vadd.xlane.f32.xlu0 %v67_v11 }
  0x2f   :  { %v64_v13 = vld [vmem:[#allocation7] sm:$0xff]  ;;  %v77_v14 = vld [vmem:[#allocation8] sm:$0xff]  ;;  %p186_p6 = pnand %p185_p5, %p179_p2 }
  0x30   :  { %87 = vadd.xlane.f32.xlu1 %v84_v12  ;;  %v65_v18 = vld [vmem:[#allocation7 + $0x8] sm:$0xff]  ;;  %v78_v20 = vld [vmem:[#allocation8 + $0x8] sm:$0xff] }
  0xb7   :  { %v69_v15 = vpop.xlane.xlu0 %68 }
  0xb8   :  { %v72_v16 = vadd.f32 %v69_v15, %v64_v13 }
  0xb9   :  { %v86_v17 = vpop.xlane.xlu1 %85 }
  0xba   :  { %v89_v19 = vadd.f32 %v86_v17, %v77_v14  ;;  %75 = vst.msk [vmem:[#allocation7] sm:$0xff] %vm55_vm0, %v72_v16 }
  0xbb   :  { %v71_v21 = vpop.xlane.xlu0 %70 }
  0xbc   :  { %91 = vst.msk [vmem:[#allocation8] sm:$0xff] %vm55_vm0, %v89_v19  ;;  %v73_v22 = vadd.f32 %v71_v21, %v65_v18 }
  0xbd   :  { %v88_v23 = vpop.xlane.xlu1 %87 }
  0xbe   :  { %v90_v24 = vadd.f32 %v88_v23, %v78_v20  ;;  %76 = vst.msk [vmem:[#allocation7 + $0x8] sm:$0xff] %vm55_vm0, %v73_v22 }
  0xbf   :  { %189 = shalt.err (!%p186_p6)
}
  0xc0   :  { %s190_s16 = scalar_lea.hbm %s334_s2, 256 }
  0xc1   :  { %p191_p7 = scmp.ne.s32.totalorder %s334_s2, %s190_s16  ;;  %p194_p8 = scmp.lt.u32.totalorder %s190_s16, %s334_s2 }
  0xc3   :  { %p196_p9 = pnand %p194_p8, %p191_p7 }
  0xc5   :  { %199 = shalt.err (!%p196_p9)
}
  0xc6   :  { %104 = dma.vmem_to_hbm [thread:$0]  %s99_s10, 256, %s334_s2, [#allocation4], %s231_s22, %s231_s22, %s232_s23   ;;  %92 = vst.msk [vmem:[#allocation8 + $0x8] sm:$0xff] %vm55_vm0, %v90_v24 }
  0xc7   :  { %s200_s25 = scalar_lea.vmem %s294_s12, 256  ;;  %p205_p11 = scmp.lt.s32.totalorder %s294_s12, %s294_s12 }
  0xc8   :  { %p201_p10 = scmp.ne.s32.totalorder %s294_s12, %s200_s25  ;;  %p206_p12 = scmp.lt.s32.totalorder %s200_s25, %s200_s25 }
  0xca   :  { %p207_p13 = por %p206_p12, %p205_p11 }
  0xcc   :  { %p208_p0 = pnand %p207_p13, %p201_p10 }
  0xce   :  { %211 = shalt.err (!%p208_p0)
}
  0xcf   :  { %s212_s28 = scalar_lea.hbm %s335_s3, 256 }
  0xd0   :  { %p213_p1 = scmp.ne.s32.totalorder %s335_s3, %s212_s28  ;;  %p216_p2 = scmp.lt.u32.totalorder %s212_s28, %s335_s3 }
  0xd2   :  { %p218_p3 = pnand %p216_p2, %p213_p1 }
  0xd4   :  { %221 = shalt.err (!%p218_p3)
}
  0xd5   :  { %116 = dma.vmem_to_hbm [thread:$0]  %s294_s12, 256, %s335_s3, [#allocation9], %s231_s22, %s231_s22, %s232_s23  }
  0xd6   :  { %226 = dma.done.wait [#allocation4], 256  }
  0xd7   :  { %227 = vsyncadd [#allocation4], 4294967040 }
  0xd8   :  { %228 = dma.done.wait [#allocation9], 256  }
  0xd9   :  { %229 = vsyncadd [#allocation9], 4294967040 }
  0xda   :  { %123 = vsyncpa [#allocation3], 1 }
  0xdb   :  { %124 = vsyncpa [#allocation6], 1 }
  0xdc   :  { %125 = vsyncpa [#allocation4], 1 }
  0xdd   :  { %126 = vsyncpa [#allocation9], 1 }

</bundles_post_ra>
